<compile_context>
chip_gen: v5e
topology: v5e:2x2
jax: 0.10.0
libtpu: 0.0.40
codegen_flags: <defaults>
</compile_context>

<pallas_src>
import jax
import jax.numpy as jnp
from jax import lax
from jax.experimental import pallas as pl
from jax.experimental.pallas import tpu as pltpu


def _round_up(n, m):
    return ((n + m - 1) // m) * m


def critic_kernel(x_ref, wbig_ref, wl_ref, bc_ref, bl_ref, out_ref):
    # x_ref:    [TB, A*F]  (VMEM)  observations, batch on sublanes, A*F on lanes
    # wbig_ref: [A*F, A]   (VMEM)  block-diagonal conv weight (resident, MXU dtype)
    # wl_ref:   [1, A]     (VMEM)  linear weight, lane-major (MXU dtype)
    # bc_ref:   [1]        (SMEM)  conv bias (scalar, f32)
    # bl_ref:   [1]        (SMEM)  linear bias (scalar, f32)
    # out_ref:  [1, TB]    (VMEM)  values, batch on lanes (lane-dense store)
    wbig = wbig_ref[...]                                 # [A*F, A], bf16 by default
    mxu_dtype = wbig.dtype

    # In-kernel cast of the MXU LHS (VPU, cheap, no extra HBM pass).  bf16
    # operands guarantee a single-pass vmatmul on v5e/v6e/v7x; the accumulation
    # is f32 via preferred_element_type.
    x = x_ref[...].astype(mxu_dtype)                                   # [TB, A*F]

    # Conv2d(1, 1, [1, F]) over all A rows as ONE MXU matmul: the conv kernel is
    # block-diagonal-expanded to [A*F, A], so h[b, a] = sum_f x[b,a,f] * wc[f].
    h = jnp.dot(x, wbig, preferred_element_type=jnp.float32)           # [TB, A]
    h = jnp.maximum(h + bc_ref[0], 0.0)                                # bias+ReLU, f32 VPU

    # Linear(A, 1), emitted batch-on-lanes:  [1, A] x [TB, A]^T -> [1, TB].
    out = lax.dot_general(
        wl_ref[...], h.astype(mxu_dtype),
        dimension_numbers=(((1,), (1,)), ((), ())),
        preferred_element_type=jnp.float32,
    ) + bl_ref[0]                                                      # [1, TB]
    out_ref[...] = out.astype(out_ref.dtype)


def prepare_critic_params(wc, bc, wl, bl, action_dim, *, mxu_dtype=jnp.bfloat16):
    """Fold the module parameters once per parameter update (not per forward).

    wc: [F] conv kernel, bc: [1] conv bias, wl: [A] linear weight, bl: [1] bias.
    Returns (wbig [A*F, A], wl_row [1, A], bc [1] f32, bl [1] f32) with the two
    weights in `mxu_dtype` (bf16 default -> single-pass MXU on every chip).
    """
    A = int(action_dim)
    F = int(wc.shape[-1])
    wc_f = wc.reshape(F).astype(jnp.float32)
    # Wbig[a*F + f, a'] = wc[f] * (a == a')  -- block-diagonal expansion, so the
    # per-(b, a) dot over F becomes a single 2-D MXU matmul (no in-kernel reshape).
    wbig = (jnp.eye(A, dtype=jnp.float32)[:, None, :]
            * wc_f[None, :, None]).reshape(A * F, A).astype(mxu_dtype)
    wl_row = wl.reshape(1, A).astype(mxu_dtype)          # lane-major linear weight
    bc_s = bc.astype(jnp.float32).reshape(1)             # SMEM scalar
    bl_s = bl.astype(jnp.float32).reshape(1)             # SMEM scalar
    return wbig, wl_row, bc_s, bl_s


def critic_forward(obs_nchw, params, *, block_batch=4096):
    """obs_nchw: [B, 1, A, F]. params: output of prepare_critic_params.
    Returns [B, 1] float32."""
    B, C, A, F = obs_nchw.shape
    assert C == 1
    assert block_batch % 128 == 0 and block_batch >= 128
    wbig, wl_row, bc_s, bl_s = params
    AF = A * F
    assert wbig.shape == (AF, A) and wl_row.shape == (1, A)

    # Lane-dense input view (free reshape of a contiguous NCHW tensor).  No
    # dtype cast here -- the MXU cast is done in-kernel so we never pay a
    # separate read-f32/write-bf16 HBM pass.  (Feed bf16 obs from upstream if
    # you also want the ~2x DMA-traffic win.)
    x = obs_nchw.reshape(B, AF)

    # Batch tiling.  Pad to 16 rows (dense sublane packing for f32 and bf16).
    # Small batches stay one block (they are launch-overhead bound anyway);
    # larger ones use >= 2 blocks so both v7x TensorCores get work, with tiles
    # up to block_batch rows to amortize the ~0.35 us per-grid-step overhead.
    Bp = _round_up(B, 16)
    if Bp <= 256:
        TB = Bp
    else:
        TB = min(block_batch, max(128, (Bp // 2 // 128) * 128))
        Bp = _round_up(Bp, TB)
    if Bp != B:
        # Padded rows compute relu(bc)*sum(wl)+bl garbage; sliced off below.
        x = jnp.pad(x, ((0, Bp - B), (0, 0)))
    grid = (Bp // TB,)

    cost = pl.CostEstimate(
        flops=2 * Bp * AF * A + 2 * Bp * A,
        transcendentals=0,
        bytes_accessed=(Bp * AF * x.dtype.itemsize
                        + AF * A * wbig.dtype.itemsize
                        + Bp * 4),
    )

    out_row = pl.pallas_call(
        critic_kernel,
        out_shape=jax.ShapeDtypeStruct((1, Bp), jnp.float32),
        grid=grid,
        in_specs=[
            pl.BlockSpec((TB, AF), lambda i: (i, 0)),              # x, batch-tiled
            pl.BlockSpec((AF, A), lambda i: (0, 0)),               # wbig, resident
            pl.BlockSpec((1, A), lambda i: (0, 0)),                # wl, lane-major
            pl.BlockSpec(memory_space=pltpu.MemorySpace.SMEM),     # bc scalar
            pl.BlockSpec(memory_space=pltpu.MemorySpace.SMEM),     # bl scalar
        ],
        out_specs=pl.BlockSpec((1, TB), lambda i: (0, i)),         # lane-dense out
        compiler_params=pltpu.CompilerParams(
            dimension_semantics=("parallel",)),                    # 2 TCs on v7x
        cost_estimate=cost,
    )(x, wbig, wl_row, bc_s, bl_s)

    # Free wrapper-side plumbing back to the PyTorch output layout [B, 1].
    return out_row[:, :B].reshape(B, 1)


def _reference(obs_nchw, wc, bc, wl, bl):
    """Pure-JAX reference mirroring the PyTorch module."""
    B, C, A, F = obs_nchw.shape
    x = obs_nchw.reshape(B, A, F)
    h = jnp.einsum("baf,f->ba", x, wc) + bc[0]     # conv -> flatten
    h = jnp.maximum(h, 0.0)                        # relu
    return h @ wl.reshape(A, 1) + bl[0]            # linear(A, 1)


if __name__ == "__main__":
    key = jax.random.PRNGKey(0)
    k_obs, k_wc, k_bc, k_wl, k_bl, k_obs2 = jax.random.split(key, 6)

    # Small shapes consistent with the module (obs is NCHW [B, 1, A, F]).
    B = 2
    action_dim = 8
    feature_dim = 16

    obs = jax.random.normal(k_obs, (B, 1, action_dim, feature_dim), jnp.float32)
    wc = jax.random.uniform(k_wc, (feature_dim,), jnp.float32, -0.25, 0.25)
    bc = jax.random.uniform(k_bc, (1,), jnp.float32, -0.25, 0.25)
    wl = jax.random.uniform(k_wl, (action_dim,), jnp.float32, -0.35, 0.35)
    bl = jax.random.uniform(k_bl, (1,), jnp.float32, -0.35, 0.35)

    # Fold parameters ONCE (per parameter update), not once per forward call.
    params_bf16 = prepare_critic_params(wc, bc, wl, bl, action_dim)
    params_f32 = prepare_critic_params(wc, bc, wl, bl, action_dim,
                                       mxu_dtype=jnp.float32)

    ref = _reference(obs, wc, bc, wl, bl)

    # Default bf16-operand / f32-accumulate path (single-pass MXU on all chips).
    out = jax.block_until_ready(critic_forward(obs, params_bf16))
    assert out.shape == (B, 1), out.shape
    assert jnp.allclose(out, ref, atol=3e-2, rtol=3e-2), (out, ref)

    # Full-precision-operand path (for callers needing tighter value fidelity).
    out_f32 = jax.block_until_ready(critic_forward(obs, params_f32))
    assert jnp.allclose(out_f32, ref, atol=2e-2, rtol=2e-2), (out_f32, ref)

    # Multi-block path: batch padding + grid >= 2 (both v7x TensorCores active).
    B2 = 300
    obs2 = jax.random.normal(k_obs2, (B2, 1, action_dim, feature_dim), jnp.float32)
    out2 = jax.block_until_ready(critic_forward(obs2, params_bf16))
    ref2 = _reference(obs2, wc, bc, wl, bl)
    assert out2.shape == (B2, 1), out2.shape
    assert jnp.allclose(out2, ref2, atol=3e-2, rtol=3e-2), (out2, ref2)

    print("KERNEL_OK")
</pallas_src>

<mosaic_0001>
module attributes {stable_mosaic.version = 11 : i64} {
  func.func @critic_kernel(%arg0: i32, %arg1: memref<16x128xf32, #tpu.memory_space<vmem>>, %arg2: memref<128x8xbf16, #tpu.memory_space<vmem>>, %arg3: memref<1x8xbf16, #tpu.memory_space<vmem>>, %arg4: memref<1xf32, #tpu.memory_space<smem>>, %arg5: memref<1xf32, #tpu.memory_space<smem>>, %arg6: memref<1x16xf32, #tpu.memory_space<vmem>>) attributes {dimension_semantics = [#tpu.dimension_semantics<parallel>], iteration_bounds = array<i64: 1>, scalar_prefetch = 0 : i64, scratch_operands = 0 : i64, tpu.core_type = #tpu.core_type<tc>, window_params = [{transform_indices = @transform_0, window_bounds = array<i64: 16, 128>}, {pipeline_mode = #tpu.pipeline_mode<synchronous>, transform_indices = @transform_1, window_bounds = array<i64: 128, 8>}, {pipeline_mode = #tpu.pipeline_mode<synchronous>, transform_indices = @transform_2, window_bounds = array<i64: 1, 8>}, {transform_indices = @transform_3, window_bounds = array<i64: 1>}, {transform_indices = @transform_4, window_bounds = array<i64: 1>}, {transform_indices = @transform_5, window_bounds = array<i64: 1, 16>}]} {
    %c0 = arith.constant 0 : index
    %c0_0 = arith.constant 0 : index
    %0 = vector.load %arg2[%c0, %c0_0] : memref<128x8xbf16, #tpu.memory_space<vmem>>, vector<128x8xbf16>
    %c0_1 = arith.constant 0 : index
    %c0_2 = arith.constant 0 : index
    %1 = vector.load %arg1[%c0_1, %c0_2] : memref<16x128xf32, #tpu.memory_space<vmem>>, vector<16x128xf32>
    %2 = arith.truncf %1 : vector<16x128xf32> to vector<16x128xbf16>
    %cst = arith.constant dense<0.000000e+00> : vector<16x8xf32>
    %3 = tpu.matmul %2, %0, %cst {dimension_numbers = #tpu.dot_dimension_numbers<[1], [0], [0], [1], [0, 0, 1, 1], [], []>} : vector<16x128xbf16>, vector<128x8xbf16>, vector<16x8xf32> -> vector<16x8xf32>
    %c0_3 = arith.constant 0 : index
    %4 = memref.load %arg4[%c0_3] : memref<1xf32, #tpu.memory_space<smem>>
    %5 = vector.broadcast %4 : f32 to vector<16x8xf32>
    %6 = arith.addf %3, %5 : vector<16x8xf32>
    %cst_4 = arith.constant 0.000000e+00 : f32
    %7 = vector.broadcast %cst_4 : f32 to vector<16x8xf32>
    %8 = arith.maximumf %6, %7 : vector<16x8xf32>
    %c0_5 = arith.constant 0 : index
    %c0_6 = arith.constant 0 : index
    %9 = vector.load %arg3[%c0_5, %c0_6] : memref<1x8xbf16, #tpu.memory_space<vmem>>, vector<1x8xbf16>
    %10 = arith.truncf %8 : vector<16x8xf32> to vector<16x8xbf16>
    %cst_7 = arith.constant dense<0.000000e+00> : vector<1x16xf32>
    %11 = tpu.matmul %9, %10, %cst_7 {dimension_numbers = #tpu.dot_dimension_numbers<[1], [1], [0], [0], [0, 0, 1, 0], [], []>} : vector<1x8xbf16>, vector<16x8xbf16>, vector<1x16xf32> -> vector<1x16xf32>
    %c0_8 = arith.constant 0 : index
    %12 = memref.load %arg5[%c0_8] : memref<1xf32, #tpu.memory_space<smem>>
    %13 = vector.broadcast %12 : f32 to vector<1x16xf32>
    %14 = arith.addf %11, %13 : vector<1x16xf32>
    %c0_9 = arith.constant 0 : index
    %c0_10 = arith.constant 0 : index
    %15 = vector.load %arg6[%c0_9, %c0_10] : memref<1x16xf32, #tpu.memory_space<vmem>>, vector<1x16xf32>
    tpu.vector_store %arg6[%c0_9, %c0_10], %14 {strides = array<i32>} : memref<1x16xf32, #tpu.memory_space<vmem>>, vector<1x16xf32>,
    return
  }
  func.func @transform_0(%arg0: i32) -> (i32, i32) {
    %c0_i32 = arith.constant 0 : i32
    %c0_i32_0 = arith.constant 0 : i32
    return %arg0, %c0_i32 : i32, i32
  }
  func.func @transform_1(%arg0: i32) -> (i32, i32) {
    %c0_i32 = arith.constant 0 : i32
    %c0_i32_0 = arith.constant 0 : i32
    %c0_i32_1 = arith.constant 0 : i32
    return %c0_i32, %c0_i32_0 : i32, i32
  }
  func.func @transform_2(%arg0: i32) -> (i32, i32) {
    %c0_i32 = arith.constant 0 : i32
    %c0_i32_0 = arith.constant 0 : i32
    %c0_i32_1 = arith.constant 0 : i32
    return %c0_i32, %c0_i32_0 : i32, i32
  }
  func.func @transform_3(%arg0: i32) -> i32 {
    %c0_i32 = arith.constant 0 : i32
    %c0_i32_0 = arith.constant 0 : i32
    return %c0_i32 : i32
  }
  func.func @transform_4(%arg0: i32) -> i32 {
    %c0_i32 = arith.constant 0 : i32
    %c0_i32_0 = arith.constant 0 : i32
    return %c0_i32 : i32
  }
  func.func @transform_5(%arg0: i32) -> (i32, i32) {
    %c0_i32 = arith.constant 0 : i32
    %c0_i32_0 = arith.constant 0 : i32
    return %c0_i32, %arg0 : i32, i32
  }
}

</mosaic_0001>

<bundles_post_ra>
// kernel: tpu_custom_call.1
= control target key start
LH: loop header
LB: loop body
LE: loop exit
PB: predicated region body
PF: predicated region fallthrough
CT: control target
= control target key end

     0   :  { %s292_s0 = inlined_call_operand.vmem [shape: f32[16,128], index: 0, kind: input, shape index: {}]   ;;  %s293_s1 = inlined_call_operand.vmem [shape: bf16[128,8], index: 1, kind: input, shape index: {}]   ;;  %s294_s2 = inlined_call_operand.vmem [shape: bf16[1,8], index: 2, kind: input, shape index: {}]   ;;  %s295_s3 = inlined_call_operand.<no memory space> [shape: f32[1], index: 3, kind: input, shape index: {}]   ;;  %s296_s4 = inlined_call_operand.<no memory space> [shape: f32[1], index: 4, kind: input, shape index: {}]   ;;  %s297_s5 = inlined_call_operand.hbm [shape: f32[1,16], index: 5, kind: output, shape index: {}]  }
   0x1   :  { %v191_v0 = vld [vmem:[%s293_s1 + $0x38] sm:$0xff]  ;;  %v190_v1 = vld [vmem:[%s293_s1 + $0x30] sm:$0xff] }
   0x2   :  { %93 = vmatpush.bf16.msra.mxu0 %v191_v0 }
   0x3   :  { %12 = vsyncpa [#allocation5], 0  ;;  %v189_v2 = vld [vmem:[%s293_s1 + $0x28] sm:$0xff]  ;;  %v188_v3 = vld [vmem:[%s293_s1 + $0x20] sm:$0xff]  ;;  %v44_v12 = vstv %s295_s3  ;;  %vm113_vm0 = vcmask 64512   ;;  %v112_v21 = vstv %s296_s4  ;;  %s219_s17 = smov [#allocation4]  }
   0x4   :  { %v187_v4 = vld [vmem:[%s293_s1 + $0x18] sm:$0xff]  ;;  %v186_v5 = vld [vmem:[%s293_s1 + $0x10] sm:$0xff]  ;;  %v185_v6 = vld [vmem:[%s293_s1 + $0x8] sm:$0xff]  ;;  %s140_s3 = sshll.u32 %s219_s17, 4  ;;  %s142_s20 = sshll.u32 %s297_s5, 4  ;;  %vm133_vm1 = vcmask 122880   ;;  %s141_s3 = int_to_ptr.vmem [resolvable:$true] %s140_s3  ;;  %s143_s20 = int_to_ptr.hbm [resolvable:$true] %s142_s20 }
   0x5   :  { %v184_v7 = vld [vmem:[%s293_s1] sm:$0xff]  ;;  %v41_v9 = vld [vmem:[%s292_s0 + $0x8] sm:$0xff] }
   0x6   :  { %94 = vmatpush.bf16.msra.mxu0 %v190_v1  ;;  %v40_v8 = vld [vmem:[%s292_s0] sm:$0xff] }
   0x7   :  { %v42_v10 = vpack.c.bf16 %v41_v9, %v40_v8  ;;  %v109_v20 = vld [vmem:[%s294_s2] sm:$0x1] }
   0xa   :  { %95 = vmatpush.bf16.msra.mxu0 %v189_v2 }
   0xe   :  { %96 = vmatpush.bf16.msra.mxu0 %v188_v3 }
  0x12   :  { %97 = vmatpush.bf16.msra.mxu0 %v187_v4 }
  0x16   :  { %98 = vmatpush.bf16.msra.mxu0 %v186_v5 }
  0x1a   :  { %99 = vmatpush.bf16.msra.mxu0 %v185_v6 }
  0x1e   :  { %100 = vmatpush.bf16.msra.mxu0 %v184_v7 }
  0x21   :  { %101 = vmatmul.bf16.vlgmr.msra.gmra.mxu0 %v42_v10 }
  0x9e   :  { %v102_v11 = vpop.f32.mrf.mxu0 }
  0x9f   :  { %v103_v13 = vadd.f32 %v102_v11, %v44_v12 }
  0xa1   :  { %v107_v16 = vmax.f32 %v103_v13, 0.0 }
  0xa6   :  { %v104_v14 = vpop.f32.mrf.mxu0 }
  0xa7   :  { %v105_v15 = vadd.f32 %v104_v14, %v44_v12 }
  0xa9   :  { %v108_v17 = vmax.f32 %v105_v15, 0.0 }
  0xab   :  { %v110_v18 = vpack.c.bf16 %v108_v17, %v107_v16 }
  0xad   :  { %v118_v19 = vsel %vm113_vm0, %v110_v18, 0 }
  0xae   :  { %127 = vmatpush.bf16.xpose.msra.mxu1 %v118_v19 }
  0xb5   :  { %183 = vmatmul.msk.bf16.vlgmr.msra.gmra.mxu1 %vm113_vm0, %v109_v20 }
 0x132   :  { %v129_v22 = vpop.f32.mrf.mxu1 }
 0x133   :  { %v130_v23 = vadd.f32 %v129_v22, %v112_v21 }
 0x135   :  { %134 = vst.msk [vmem:[#allocation4] sm:$0x1] %vm133_vm1, %v130_v23 }
 0x136   :  { %145 = dma.vmem_to_hbm [thread:$0]  %s141_s3, 16, %s143_s20, [#allocation5]  }
 0x13a   :  { %v131_v24 = vpop.f32.mrf.mxu1 }
 0x13b   :  { %217 = dma.done.wait [#allocation5], 16  }
 0x13c   :  { %218 = vsyncadd [#allocation5], 4294967280 }
 0x13d   :  { %150 = vsyncpa [#allocation5], 1 }

</bundles_post_ra>
